<compile_context>
chip_gen: v7x
topology: tpu7x:2x2x1
jax: 0.10.0
libtpu: 0.0.40
codegen_flags: <defaults>
</compile_context>

<pallas_src>
import jax
import jax.numpy as jnp
from jax.experimental import pallas as pl
from jax.experimental.pallas import tpu as pltpu

F_DIM = 65   # true feature width fixed by the module (65x65 weight)
F_PAD = 128  # lane-dense padded width (multiple of 128)


def gcn_kernel(x2d_ref, a_ref, w_ref, b_ref, o_ref):
    # x2d_ref: (B*N, F_PAD)  a_ref: (B, N, N)  w_ref: (F_PAD, F_PAD)
    # b_ref:   (1, F_PAD)    o_ref: (B, N, F_PAD)
    B, N, _ = a_ref.shape

    # Hoisted weight GEMM over all graphs at once: (B*N, 128) @ (128, 128).
    xw = jnp.dot(x2d_ref[...], w_ref[...], preferred_element_type=jnp.float32)
    xw = xw.reshape(B, N, F_PAD)

    # Per-graph aggregation A @ (X W): batched matmul on the MXU.
    out = jnp.einsum("bnm,bmf->bnf", a_ref[...], xw,
                     preferred_element_type=jnp.float32)
    out = out + b_ref[...]          # (1, F_PAD) broadcasts over (B, N)
    out = jnp.maximum(out, 0.0)     # ReLU
    o_ref[...] = out.astype(o_ref.dtype)


def gcn_forward(X, A, W, bias):
    B, N, F = X.shape
    assert F == F_DIM and A.shape == (B, N, N)

    # Zero-pad feature dim to 128 (lane-dense) and fold batch into the W GEMM.
    pad = F_PAD - F
    Xp = jnp.pad(X, ((0, 0), (0, 0), (0, pad))).reshape(B * N, F_PAD)
    Wp = jnp.pad(W, ((0, pad), (0, pad)))            # zero rows & cols
    bp = jnp.pad(bias, (0, pad)).reshape(1, F_PAD)   # zero tail

    flops = 2 * B * N * F_PAD * F_PAD + 2 * B * N * N * F_PAD
    bytes_accessed = 4 * (2 * B * N * F_PAD + B * N * N + F_PAD * F_PAD + F_PAD)

    out_p = pl.pallas_call(
        gcn_kernel,
        out_shape=jax.ShapeDtypeStruct((B, N, F_PAD), X.dtype),
        # Single invocation (empty grid): all operands resident in VMEM,
        # zero per-step pipeline overhead at this problem size.
        in_specs=[
            pl.BlockSpec(memory_space=pltpu.MemorySpace.VMEM),  # X (B*N, 128)
            pl.BlockSpec(memory_space=pltpu.MemorySpace.VMEM),  # A (B, N, N)
            pl.BlockSpec(memory_space=pltpu.MemorySpace.VMEM),  # W (128, 128)
            pl.BlockSpec(memory_space=pltpu.MemorySpace.VMEM),  # bias (1, 128)
        ],
        out_specs=pl.BlockSpec(memory_space=pltpu.MemorySpace.VMEM),
        cost_estimate=pl.CostEstimate(
            flops=flops, transcendentals=0, bytes_accessed=bytes_accessed),
    )(Xp, A, Wp, bp)

    out = out_p[..., :F]  # drop the padded (identically-zero) feature columns
    # Module returns (out, A) — mirror that.
    return out, A


def gcn_reference(X, A, W, bias):
    xw = jnp.einsum("bnf,fg->bng", X, W)
    out = jnp.einsum("bnm,bmg->bng", A, xw) + bias
    return jnp.maximum(out, 0.0), A


# TODO(synk): GraphModel.forward also uses self.att (GraphAttentionLayer) and a
# proj head (Linear + BatchNorm1d); GraphAttentionLayer is not defined in the
# spec, so only the GCN block (the defined dependent class) is implemented.

if __name__ == "__main__":
    key = jax.random.PRNGKey(0)
    k_x, k_a, k_w = jax.random.split(key, 3)

    B, N = 2, 8  # small batch of graphs, 8 nodes each, 65 features (fixed)
    X = jax.random.normal(k_x, (B, N, F_DIM), dtype=jnp.float32)
    A = jax.random.normal(k_a, (B, N, N), dtype=jnp.float32)

    # Parameter shapes match nn.Parameter(torch.randn(65,65)) / torch.zeros(65).
    W = jax.random.normal(k_w, (F_DIM, F_DIM), dtype=jnp.float32)
    bias = jnp.zeros((F_DIM,), dtype=jnp.float32)

    out, a_out = gcn_forward(X, A, W, bias)
    jax.block_until_ready(out)

    ref_out, _ = gcn_reference(X, A, W, bias)
    assert out.shape == ref_out.shape, "shape mismatch vs reference"
    assert jnp.allclose(out, ref_out, atol=1e-4, rtol=1e-4), "mismatch vs reference"

    print("KERNEL_OK")
</pallas_src>

<mosaic_0001>
module attributes {stable_mosaic.version = 11 : i64} {
  func.func @gcn_kernel(%arg0: memref<16x128xf32, #tpu.memory_space<vmem>>, %arg1: memref<2x8x8xf32, #tpu.memory_space<vmem>>, %arg2: memref<128x128xf32, #tpu.memory_space<vmem>>, %arg3: memref<1x128xf32, #tpu.memory_space<vmem>>, %arg4: memref<2x8x128xf32, #tpu.memory_space<vmem>>) attributes {dimension_semantics = [], scalar_prefetch = 0 : i64, scratch_operands = 0 : i64, tpu.core_type = #tpu.core_type<tc>} {
    %c0 = arith.constant 0 : index
    %c0_0 = arith.constant 0 : index
    %0 = vector.load %arg0[%c0, %c0_0] : memref<16x128xf32, #tpu.memory_space<vmem>>, vector<16x128xf32>
    %c0_1 = arith.constant 0 : index
    %c0_2 = arith.constant 0 : index
    %1 = vector.load %arg2[%c0_1, %c0_2] : memref<128x128xf32, #tpu.memory_space<vmem>>, vector<128x128xf32>
    %cst = arith.constant dense<0.000000e+00> : vector<16x128xf32>
    %2 = tpu.matmul %0, %1, %cst {dimension_numbers = #tpu.dot_dimension_numbers<[1], [0], [0], [1], [0, 0, 1, 1], [], []>} : vector<16x128xf32>, vector<128x128xf32>, vector<16x128xf32> -> vector<16x128xf32>
    %3 = vector.shape_cast %2 : vector<16x128xf32> to vector<2x8x128xf32>
    %c0_3 = arith.constant 0 : index
    %c0_4 = arith.constant 0 : index
    %c0_5 = arith.constant 0 : index
    %4 = vector.load %arg1[%c0_3, %c0_4, %c0_5] : memref<2x8x8xf32, #tpu.memory_space<vmem>>, vector<2x8x8xf32>
    "tpu.trace_start"() <{level = 10 : i32, message = "bnm,bmf->bnf"}> : () -> ()
    %cst_6 = arith.constant dense<0.000000e+00> : vector<2x8x128xf32>
    %5 = tpu.matmul %4, %3, %cst_6 {dimension_numbers = #tpu.dot_dimension_numbers<[2], [1], [1], [2], [0, 0, 0, 1, 1, 2], [0], [0]>} : vector<2x8x8xf32>, vector<2x8x128xf32>, vector<2x8x128xf32> -> vector<2x8x128xf32>
    "tpu.trace_stop"() : () -> ()
    %c0_7 = arith.constant 0 : index
    %c0_8 = arith.constant 0 : index
    %6 = vector.load %arg3[%c0_7, %c0_8] : memref<1x128xf32, #tpu.memory_space<vmem>>, vector<1x128xf32>
    %7 = vector.shape_cast %6 : vector<1x128xf32> to vector<1x1x128xf32>
    %8 = vector.broadcast %7 : vector<1x1x128xf32> to vector<2x8x128xf32>
    %9 = arith.addf %5, %8 : vector<2x8x128xf32>
    %cst_9 = arith.constant 0.000000e+00 : f32
    %10 = vector.broadcast %cst_9 : f32 to vector<2x8x128xf32>
    %11 = arith.maximumf %9, %10 : vector<2x8x128xf32>
    %c0_10 = arith.constant 0 : index
    %c0_11 = arith.constant 0 : index
    %c0_12 = arith.constant 0 : index
    %12 = vector.load %arg4[%c0_10, %c0_11, %c0_12] : memref<2x8x128xf32, #tpu.memory_space<vmem>>, vector<2x8x128xf32>
    tpu.vector_store %arg4[%c0_10, %c0_11, %c0_12], %11 {strides = array<i32>} : memref<2x8x128xf32, #tpu.memory_space<vmem>>, vector<2x8x128xf32>,
    return
  }
}

</mosaic_0001>

<bundles_post_ra>
// kernel: tpu_custom_call.1
= control target key start
LH: loop header
LB: loop body
LE: loop exit
PB: predicated region body
PF: predicated region fallthrough
CT: control target
= control target key end

     0   :  { %9 = vsyncpa [#allocation3], 0  ;;  %s637_s0 = inlined_call_operand.hbm [shape: f32[16,128], index: 0, kind: input, shape index: {}]   ;;  %s638_s1 = inlined_call_operand.hbm [shape: f32[2,8,8], index: 1, kind: input, shape index: {}]   ;;  %s639_s2 = inlined_call_operand.hbm [shape: f32[128,128], index: 2, kind: input, shape index: {}]   ;;  %s640_s3 = inlined_call_operand.vmem [shape: f32[1,128], index: 3, kind: input, shape index: {}]   ;;  %s641_s4 = inlined_call_operand.hbm [shape: f32[2,8,128], index: 4, kind: output, shape index: {}]  }
   0x1   :  { %10 = vsyncpa [#allocation6], 0 }
   0x2   :  { %11 = vsyncpa [#allocation4], 0  ;;  %s534_s15 = smov [#allocation5]   ;;  %s535_s17 = smov [#allocation2]  }
   0x3   :  { %s29_s16 = sshll.u32 %s534_s15, 4  ;;  %s17_s18 = sshll.u32 %s535_s17, 4  ;;  %s30_s16 = int_to_ptr.vmem [resolvable:$true] %s29_s16  ;;  %s567_s18 = int_to_ptr.vmem [resolvable:$true] %s17_s18 }
   0x4   :  { %s440_s21 = scalar_lea.hbm %s638_s1, 256 }
   0x5   :  { %p441_p0 = scmp.ne.s32.totalorder %s638_s1, %s440_s21  ;;  %p444_p1 = scmp.lt.u32.totalorder %s440_s21, %s638_s1 }
   0x7   :  { %p446_p2 = pnand %p444_p1, %p441_p0 }
   0x9   :  { %449 = shalt.err (!%p446_p2)
}
   0xa   :  { %s450_s26 = scalar_lea.vmem %s30_s16, 256  ;;  %p455_p4 = scmp.lt.s32.totalorder %s30_s16, %s30_s16 }
   0xb   :  { %p451_p3 = scmp.ne.s32.totalorder %s30_s16, %s450_s26  ;;  %p456_p5 = scmp.lt.s32.totalorder %s450_s26, %s450_s26 }
   0xd   :  { %p457_p6 = por %p456_p5, %p455_p4 }
   0xf   :  { %p458_p7 = pnand %p457_p6, %p451_p3 }
  0x11   :  { %461 = shalt.err (!%p458_p7)
}
  0x12   :  { %s536_s27 = smov 128   ;;  %s537_s28 = smov 8  }
  0x13   :  { %35 = dma.hbm_to_vmem [thread:$0]  %s638_s1, 256, %s30_s16, [#allocation6], %s536_s27, %s536_s27, %s537_s28  }
  0x14   :  { %s462_s7 = scalar_lea.hbm %s637_s0, 256 }
  0x15   :  { %p463_p8 = scmp.ne.s32.totalorder %s637_s0, %s462_s7  ;;  %p466_p9 = scmp.lt.u32.totalorder %s462_s7, %s637_s0 }
  0x17   :  { %p468_p10 = pnand %p466_p9, %p463_p8 }
  0x19   :  { %471 = shalt.err (!%p468_p10)
}
  0x1a   :  { %s472_s12 = scalar_lea.vmem %s567_s18, 256  ;;  %p477_p12 = scmp.lt.s32.totalorder %s567_s18, %s567_s18 }
  0x1b   :  { %p473_p11 = scmp.ne.s32.totalorder %s567_s18, %s472_s12  ;;  %p478_p13 = scmp.lt.s32.totalorder %s472_s12, %s472_s12 }
  0x1d   :  { %p479_p0 = por %p478_p13, %p477_p12 }
  0x1f   :  { %p480_p1 = pnand %p479_p0, %p473_p11 }
  0x21   :  { %483 = shalt.err (!%p480_p1)
}
  0x22   :  { %23 = dma.hbm_to_vmem [thread:$0]  %s637_s0, 256, %s567_s18, [#allocation3], %s536_s27, %s536_s27, %s537_s28  }
  0x23   :  { %s538_s14 = smov [#allocation7]   ;;  %s484_s19 = scalar_lea.hbm %s639_s2, 2048 }
  0x24   :  { %s41_s15 = sshll.u32 %s538_s14, 4  ;;  %p485_p2 = scmp.ne.s32.totalorder %s639_s2, %s484_s19  ;;  %s42_s15 = int_to_ptr.vmem [resolvable:$true] %s41_s15 }
  0x25   :  { %p488_p3 = scmp.lt.u32.totalorder %s484_s19, %s639_s2 }
  0x27   :  { %p490_p4 = pnand %p488_p3, %p485_p2 }
  0x29   :  { %493 = shalt.err (!%p490_p4)
}
  0x2a   :  { %s494_s24 = scalar_lea.vmem %s42_s15, 2048  ;;  %p499_p6 = scmp.lt.s32.totalorder %s42_s15, %s42_s15 }
  0x2b   :  { %p495_p5 = scmp.ne.s32.totalorder %s42_s15, %s494_s24  ;;  %p500_p7 = scmp.lt.s32.totalorder %s494_s24, %s494_s24 }
  0x2d   :  { %p501_p8 = por %p500_p7, %p499_p6 }
  0x2f   :  { %p502_p9 = pnand %p501_p8, %p495_p5 }
  0x31   :  { %505 = shalt.err (!%p502_p9)
}
  0x32   :  { %47 = dma.hbm_to_vmem [thread:$0]  %s639_s2, 2048, %s42_s15, [#allocation6], %s536_s27, %s536_s27, %s537_s28  }
  0x33   :  { %528 = dma.done.wait [#allocation3], 256  }
  0x34   :  { %529 = vsyncadd [#allocation3], 4294967040 }
  0x35   :  { %530 = dma.done.wait [#allocation6], 2304  }
  0x36   :  { %531 = vsyncadd [#allocation6], 4294964992  ;;  %v61_v0 = vld [vmem:[#allocation7] sm:$0xff]  ;;  %v62_v1 = vld [vmem:[#allocation7 + $0x8] sm:$0xff]  ;;  %v539_v26 = vmov 0.0   ;;  %vm540_vm0 = vmmov 0  }
  0x37   :  { %v63_v2 = vld [vmem:[#allocation7 + $0x10] sm:$0xff]  ;;  %v400_v3 = vpack.c.bf16 %v62_v1, %v61_v0  ;;  %v64_v4 = vld [vmem:[#allocation7 + $0x18] sm:$0xff]  ;;  %v65_v6 = vld [vmem:[#allocation7 + $0x20] sm:$0xff]  ;;  %390 = vmatprep.subr.mxu1 %v539_v26  ;;  %392 = vmatprep.mubr.msk.f32.mxu1 %vm540_vm0, %v539_v26  ;;  %vm161_vm1 = vcmask 64512   ;;  %s541_s26 = smov [#allocation8]  }
  0x38   :  { %v404_v5 = vpack.c.bf16 %v64_v4, %v63_v2  ;;  %v66_v7 = vld [vmem:[#allocation7 + $0x28] sm:$0xff]  ;;  %v59_v9 = vld [vmem:[#allocation2] sm:$0xff]  ;;  %v67_v10 = vld [vmem:[#allocation7 + $0x30] sm:$0xff]  ;;  %s317_s29 = sshll.u32 %s541_s26, 4  ;;  %s318_s29 = int_to_ptr.vmem [resolvable:$true] %s317_s29 }
  0x39   :  { %401 = vmatprep.subr.bf16.mxu0 %v400_v3  ;;  %v408_v8 = vpack.c.bf16 %v66_v7, %v65_v6  ;;  %v68_v11 = vld [vmem:[#allocation7 + $0x38] sm:$0xff]  ;;  %387 = vmatprep.mubr.f32.mxu0 %v59_v9  ;;  %v69_v13 = vld [vmem:[#allocation7 + $0x40] sm:$0xff]  ;;  %v70_v14 = vld [vmem:[#allocation7 + $0x48] sm:$0xff]  ;;  %s506_s30 = scalar_lea.vmem %s318_s29, 256  ;;  %p511_p11 = scmp.lt.s32.totalorder %s318_s29, %s318_s29 }
  0x3a   :  { %403 = vmatpush3.bf16.msra.mxu0 %v400_v3  ;;  %v412_v12 = vpack.c.bf16 %v68_v11, %v67_v10  ;;  %v416_v15 = vpack.c.bf16 %v70_v14, %v69_v13  ;;  %v71_v16 = vld [vmem:[#allocation7 + $0x50] sm:$0xff]  ;;  %v72_v17 = vld [vmem:[#allocation7 + $0x58] sm:$0xff]  ;;  %v73_v19 = vld [vmem:[#allocation7 + $0x60] sm:$0xff]  ;;  %p507_p10 = scmp.ne.s32.totalorder %s318_s29, %s506_s30  ;;  %p512_p12 = scmp.lt.s32.totalorder %s506_s30, %s506_s30 }
  0x3b   :  { %405 = vmatprep.subr.bf16.mxu0 %v404_v5  ;;  %v420_v18 = vpack.c.bf16 %v72_v17, %v71_v16  ;;  %v74_v20 = vld [vmem:[#allocation7 + $0x68] sm:$0xff]  ;;  %v75_v22 = vld [vmem:[#allocation7 + $0x70] sm:$0xff]  ;;  %v76_v23 = vld [vmem:[#allocation7 + $0x78] sm:$0xff] }
  0x3c   :  { %v424_v21 = vpack.c.bf16 %v74_v20, %v73_v19  ;;  %v428_v24 = vpack.c.bf16 %v76_v23, %v75_v22  ;;  %v60_v25 = vld [vmem:[#allocation2 + $0x8] sm:$0xff]  ;;  %v152_v28 = vld [vmem:[#allocation5] sm:$0xff]  ;;  %v153_v30 = vld [vmem:[#allocation5 + $0x8] sm:$0xff]  ;;  %p513_p13 = por %p512_p12, %p511_p11 }
  0x3d   :  { %v330_v31 = vld [vmem:[%s640_s3] ss:$0 sm:$0xff] }
  0x3e   :  { %407 = vmatpush3.bf16.msra.mxu0 %v404_v5  ;;  %p514_p0 = pnand %p513_p13, %p507_p10 }
  0x3f   :  { %409 = vmatprep.subr.bf16.mxu0 %v408_v8 }
  0x42   :  { %411 = vmatpush3.bf16.msra.mxu0 %v408_v8 }
  0x43   :  { %413 = vmatprep.subr.bf16.mxu0 %v412_v12 }
  0x46   :  { %415 = vmatpush3.bf16.msra.mxu0 %v412_v12 }
  0x47   :  { %417 = vmatprep.subr.bf16.mxu0 %v416_v15 }
  0x4a   :  { %419 = vmatpush3.bf16.msra.mxu0 %v416_v15 }
  0x4b   :  { %421 = vmatprep.subr.bf16.mxu0 %v420_v18 }
  0x4e   :  { %423 = vmatpush3.bf16.msra.mxu0 %v420_v18 }
  0x4f   :  { %425 = vmatprep.subr.bf16.mxu0 %v424_v21 }
  0x52   :  { %427 = vmatpush3.bf16.msra.mxu0 %v424_v21 }
  0x53   :  { %429 = vmatprep.subr.bf16.mxu0 %v428_v24 }
  0x56   :  { %431 = vmatpush3.bf16.msra.mxu0 %v428_v24 }
  0x59   :  { %388 = vmatmul.mubr.f32.vlgmr.msra.gmra.mrb[0].mxu0 %v60_v25 }
 0x12c   :  { %v389_v27 = vpop.f32.mrb[0].mxu0 }
 0x12d   :  { %v143_v29 = vpop.f32.mrb[1].mxu0 }
 0x12e   :  { %391 = vmatpush3.msra.mxu1 %v143_v29 }
 0x12f   :  { %393 = vmatmul.mubr.msk.f32.vlgmr.msra.gmra.mrb[0].mxu1 %vm161_vm1, %v152_v28  ;;  %395 = vmatprep.subr.mxu1 %v539_v26 }
 0x130   :  { %396 = vmatpush3.msra.mxu1 %v389_v27  ;;  %397 = vmatprep.mubr.msk.f32.mxu1 %vm540_vm0, %v539_v26 }
 0x133   :  { %398 = vmatmul.mubr.msk.f32.vlgmr.msra.gmra.mrb[2].mxu1 %vm161_vm1, %v153_v30 }
 0x202   :  { %v231_v32 = vpop.f32.mrb[0].mxu1 }
 0x203   :  { %v232_v33 = vadd.f32 %v330_v31, %v231_v32  ;;  %v394_v34 = vpop.f32.mrb[1].mxu1 }
 0x205   :  { %v308_v35 = vmax.f32 %v232_v33, 0.0 }
 0x206   :  { %v304_v36 = vpop.f32.mrb[2].mxu1 }
 0x207   :  { %310 = vst [vmem:[#allocation8] sm:$0xff] %v308_v35  ;;  %v305_v37 = vadd.f32 %v330_v31, %v304_v36  ;;  %v399_v38 = vpop.f32.mrb[3].mxu1 }
 0x209   :  { %v309_v39 = vmax.f32 %v305_v37, 0.0 }
 0x20b   :  { %311 = vst [vmem:[#allocation8 + $0x8] sm:$0xff] %v309_v39 }
 0x20c   :  { %517 = shalt.err (!%p514_p0)
}
 0x20d   :  { %s518_s6 = scalar_lea.hbm %s641_s4, 256 }
 0x20e   :  { %p519_p1 = scmp.ne.s32.totalorder %s641_s4, %s518_s6  ;;  %p522_p2 = scmp.lt.u32.totalorder %s518_s6, %s641_s4 }
 0x210   :  { %p524_p3 = pnand %p522_p2, %p519_p1 }
 0x212   :  { %527 = shalt.err (!%p524_p3)
}
 0x213   :  { %323 = dma.vmem_to_hbm [thread:$0]  %s318_s29, 256, %s641_s4, [#allocation4], %s536_s27, %s536_s27, %s537_s28  }
 0x214   :  { %532 = dma.done.wait [#allocation4], 256  }
 0x215   :  { %533 = vsyncadd [#allocation4], 4294967040 }
 0x216   :  { %327 = vsyncpa [#allocation3], 1 }
 0x217   :  { %328 = vsyncpa [#allocation6], 1 }
 0x218   :  { %329 = vsyncpa [#allocation4], 1 }

</bundles_post_ra>
